<compile_context>
chip_gen: v7x
topology: tpu7x:2x2x1
jax: 0.10.0
libtpu: 0.0.40
codegen_flags: <defaults>
</compile_context>

<pallas_src>
import jax
import jax.numpy as jnp
from jax import lax
from jax.experimental import pallas as pl
from jax.experimental.pallas import tpu as pltpu

HIDDEN = 64
LANE = 128            # padded feature width (lane-dense for MXU / vst)
LOG_STD_MIN = -20.0
LOG_STD_MAX = 2.0
TB_MAX = 1024         # max batch-tile rows per grid step


def _round_up(x, m):
    return ((x + m - 1) // m) * m


def _make_policy_kernel(k1, action_dim):
    """Build the kernel with static slab offsets baked in."""

    def kernel(x_ref, w_ref, b_ref, out_ref):
        bf16 = jnp.bfloat16
        f32 = jnp.float32

        x = x_ref[...].astype(bf16)                           # (TB, k1) f32 -> bf16
        r = 0

        # linear1 + relu (K = k1 = round_up(state_dim, 8), not 128)
        h = jnp.dot(x, w_ref[r:r + k1, :], preferred_element_type=f32)
        h = jnp.maximum(h + b_ref[0:1, :], 0.0)
        r += k1

        # linear2 + relu
        h = jnp.dot(h.astype(bf16), w_ref[r:r + LANE, :],
                    preferred_element_type=f32)
        h = jnp.maximum(h + b_ref[1:2, :], 0.0)
        r += LANE

        # linear3 + relu
        h = jnp.dot(h.astype(bf16), w_ref[r:r + LANE, :],
                    preferred_element_type=f32)
        h = jnp.maximum(h + b_ref[2:3, :], 0.0)
        r += LANE

        # linear4 + hardswish:  hw(z) = z * clip(z + 3, 0, 6) / 6
        z = jnp.dot(h.astype(bf16), w_ref[r:r + LANE, :],
                    preferred_element_type=f32)
        z = z + b_ref[3:4, :]
        h = z * jnp.clip(z + 3.0, 0.0, 6.0) * (1.0 / 6.0)
        r += LANE

        # fused heads: columns [0:A) = mean, [A:2A) = log_std, rest = pad garbage
        y = jnp.dot(h.astype(bf16), w_ref[r:r + LANE, :],
                    preferred_element_type=f32)
        y = y + b_ref[4:5, :]

        col = lax.broadcasted_iota(jnp.int32, y.shape, 1)
        is_log_std = (col >= action_dim) & (col < 2 * action_dim)
        y = jnp.where(is_log_std, jnp.clip(y, LOG_STD_MIN, LOG_STD_MAX), y)

        out_ref[...] = y.astype(out_ref.dtype)                # lane-dense bf16 store

    return kernel


def pack_params(params, state_dim, action_dim):
    """Pack weights into one bf16 slab and biases into one f32 slab.

    Call ONCE (outside the jitted forward); the slabs are reused every step.
    """
    assert 2 * action_dim <= LANE, "fused head must fit in 128 lanes"
    k1 = _round_up(state_dim, 8)

    def pad2(a, rows, cols=LANE):
        out = jnp.zeros((rows, cols), jnp.float32)
        return out.at[:a.shape[0], :a.shape[1]].set(a.astype(jnp.float32))

    w_head = jnp.concatenate([params["wm"], params["ws"]], axis=1)  # (64, 2A)
    b_head = jnp.concatenate([params["bm"], params["bs"]], axis=1)  # (1, 2A)

    w_slab = jnp.concatenate(
        [
            pad2(params["w1"], k1),      # rows [0, k1)
            pad2(params["w2"], LANE),
            pad2(params["w3"], LANE),
            pad2(params["w4"], LANE),
            pad2(w_head, LANE),
        ],
        axis=0,
    ).astype(jnp.bfloat16)               # (k1 + 4*128, 128) bf16

    b_slab = jnp.concatenate(
        [
            pad2(params["b1"], 1),
            pad2(params["b2"], 1),
            pad2(params["b3"], 1),
            pad2(params["b4"], 1),
            pad2(b_head, 1),
            jnp.zeros((3, LANE), jnp.float32),
        ],
        axis=0,
    )                                     # (8, 128) f32

    return w_slab, b_slab


def policy_net_forward(state, w_slab, b_slab, *, action_dim):
    """PolicyNet forward: state (B, state_dim) f32 -> (mean, log_std)."""
    B, state_dim = state.shape
    k1 = _round_up(state_dim, 8)
    if state_dim != k1:                      # no-op for 8-aligned state dims
        state = jnp.pad(state, ((0, 0), (0, k1 - state_dim)))
    w_rows = w_slab.shape[0]
    assert w_rows == k1 + 4 * LANE, "slab was packed for a different state_dim"

    # Batch tile: at least 2 grid steps when B > 8 (keeps both v7x TCs busy),
    # capped at TB_MAX so large batches get a few long MXU-friendly tiles.
    # VMEM footprint is <1 MiB either way, so it does not constrain TB.
    TB = min(TB_MAX, max(8, _round_up(pl.cdiv(B, 2), 8)))
    n_blocks = pl.cdiv(B, TB)                # partial last block handled by Pallas

    flops = 2 * B * (k1 * LANE + 4 * LANE * LANE)
    bytes_accessed = (B * k1 * 4             # state (f32, un-padded lanes)
                      + w_rows * LANE * 2    # weight slab (bf16)
                      + 8 * LANE * 4         # bias slab (f32)
                      + B * LANE * 2)        # output slab (bf16)

    out = pl.pallas_call(
        _make_policy_kernel(k1, action_dim),
        out_shape=jax.ShapeDtypeStruct((B, LANE), jnp.bfloat16),
        grid=(n_blocks,),
        in_specs=[
            pl.BlockSpec((TB, k1), lambda i: (i, 0)),          # streamed batch tile
            pl.BlockSpec((w_rows, LANE), lambda i: (0, 0)),    # resident weights
            pl.BlockSpec((8, LANE), lambda i: (0, 0)),         # resident biases
        ],
        out_specs=pl.BlockSpec((TB, LANE), lambda i: (i, 0)),
        compiler_params=pltpu.CompilerParams(
            dimension_semantics=("parallel",),                 # 2-TC sharding on v7x
        ),
        cost_estimate=pl.CostEstimate(
            flops=flops, transcendentals=0, bytes_accessed=bytes_accessed),
    )(state, w_slab, b_slab)

    mean = out[:, :action_dim].astype(jnp.float32)
    log_std = out[:, action_dim:2 * action_dim].astype(jnp.float32)
    return mean, log_std


def init_params(key, state_dim, action_dim):
    """Deterministic synthetic init (PyTorch-Linear-like uniform bounds)."""
    def linear(k, fan_in, fan_out):
        kw, kb = jax.random.split(k)
        bound = 1.0 / jnp.sqrt(fan_in)
        w = jax.random.uniform(kw, (fan_in, fan_out), jnp.float32, -bound, bound)
        b = jax.random.uniform(kb, (1, fan_out), jnp.float32, -bound, bound)
        return w, b

    keys = jax.random.split(key, 6)
    w1, b1 = linear(keys[0], state_dim, HIDDEN)
    w2, b2 = linear(keys[1], HIDDEN, HIDDEN)
    w3, b3 = linear(keys[2], HIDDEN, HIDDEN)
    w4, b4 = linear(keys[3], HIDDEN, HIDDEN)
    wm, bm = linear(keys[4], HIDDEN, action_dim)
    ws, bs = linear(keys[5], HIDDEN, action_dim)
    return {
        "w1": w1, "b1": b1, "w2": w2, "b2": b2,
        "w3": w3, "b3": b3, "w4": w4, "b4": b4,
        "wm": wm, "bm": bm, "ws": ws, "bs": bs,
    }


def _reference_forward(state, p):
    """Pure-JAX reference with the same bf16 quantization of matmul operands."""
    bf16 = jnp.bfloat16

    def mm(a, w):
        return jnp.dot(a.astype(bf16), w.astype(bf16),
                       preferred_element_type=jnp.float32)

    h = jnp.maximum(mm(state, p["w1"]) + p["b1"], 0.0)
    h = jnp.maximum(mm(h, p["w2"]) + p["b2"], 0.0)
    h = jnp.maximum(mm(h, p["w3"]) + p["b3"], 0.0)
    z = mm(h, p["w4"]) + p["b4"]
    h = z * jnp.clip(z + 3.0, 0.0, 6.0) / 6.0
    mean = mm(h, p["wm"]) + p["bm"]
    log_std = jnp.clip(mm(h, p["ws"]) + p["bs"], LOG_STD_MIN, LOG_STD_MAX)
    return mean, log_std


if __name__ == "__main__":
    key = jax.random.PRNGKey(0)
    k_params, k_state, k_state_big = jax.random.split(key, 3)

    state_dim = 32
    action_dim = 8
    params = init_params(k_params, state_dim, action_dim)

    # Pack the weights ONCE, outside the jitted forward (perf-review item 1).
    w_slab, b_slab = pack_params(params, state_dim, action_dim)
    jax.block_until_ready((w_slab, b_slab))

    forward = jax.jit(policy_net_forward, static_argnames="action_dim")

    # Small-shape check (single grid step).
    batch = 8
    state = jax.random.normal(k_state, (batch, state_dim), jnp.float32)
    mean, log_std = forward(state, w_slab, b_slab, action_dim=action_dim)
    jax.block_until_ready((mean, log_std))

    ref_mean, ref_log_std = _reference_forward(state, params)
    assert mean.shape == (batch, action_dim)
    assert log_std.shape == (batch, action_dim)
    assert jnp.allclose(mean, ref_mean, atol=3e-2, rtol=3e-2)
    assert jnp.allclose(log_std, ref_log_std, atol=3e-2, rtol=3e-2)

    # Larger, non-tile-aligned batch exercising the multi-step grid
    # (cdiv grid, TB = 520 -> 2 full blocks, zero tail waste).
    batch_big = 1040
    state_big = jax.random.normal(k_state_big, (batch_big, state_dim), jnp.float32)
    mean_b, log_std_b = forward(state_big, w_slab, b_slab, action_dim=action_dim)
    jax.block_until_ready((mean_b, log_std_b))
    ref_mean_b, ref_log_std_b = _reference_forward(state_big, params)
    assert mean_b.shape == (batch_big, action_dim)
    assert jnp.allclose(mean_b, ref_mean_b, atol=3e-2, rtol=3e-2)
    assert jnp.allclose(log_std_b, ref_log_std_b, atol=3e-2, rtol=3e-2)

    print("KERNEL_OK")
</pallas_src>

<mosaic_0001>
module attributes {stable_mosaic.version = 11 : i64} {
  func.func @kernel(%arg0: i32, %arg1: memref<8x32xf32, #tpu.memory_space<vmem>>, %arg2: memref<544x128xbf16, #tpu.memory_space<vmem>>, %arg3: memref<8x128xf32, #tpu.memory_space<vmem>>, %arg4: memref<8x128xbf16, #tpu.memory_space<vmem>>) attributes {dimension_semantics = [#tpu.dimension_semantics<parallel>], iteration_bounds = array<i64: 1>, scalar_prefetch = 0 : i64, scratch_operands = 0 : i64, tpu.core_type = #tpu.core_type<tc>, window_params = [{transform_indices = @transform_0, window_bounds = array<i64: 8, 32>}, {pipeline_mode = #tpu.pipeline_mode<synchronous>, transform_indices = @transform_1, window_bounds = array<i64: 544, 128>}, {pipeline_mode = #tpu.pipeline_mode<synchronous>, transform_indices = @transform_2, window_bounds = array<i64: 8, 128>}, {transform_indices = @transform_3, window_bounds = array<i64: 8, 128>}]} {
    %c0 = arith.constant 0 : index
    %c0_0 = arith.constant 0 : index
    %0 = vector.load %arg1[%c0, %c0_0] : memref<8x32xf32, #tpu.memory_space<vmem>>, vector<8x32xf32>
    %1 = arith.truncf %0 : vector<8x32xf32> to vector<8x32xbf16>
    %c0_1 = arith.constant 0 : index
    %c0_2 = arith.constant 0 : index
    %2 = vector.load %arg2[%c0_1, %c0_2] : memref<544x128xbf16, #tpu.memory_space<vmem>>, vector<32x128xbf16>
    %cst = arith.constant dense<0.000000e+00> : vector<8x128xf32>
    %3 = tpu.matmul %1, %2, %cst {dimension_numbers = #tpu.dot_dimension_numbers<[1], [0], [0], [1], [0, 0, 1, 1], [], []>} : vector<8x32xbf16>, vector<32x128xbf16>, vector<8x128xf32> -> vector<8x128xf32>
    %c0_3 = arith.constant 0 : index
    %c0_4 = arith.constant 0 : index
    %4 = vector.load %arg3[%c0_3, %c0_4] : memref<8x128xf32, #tpu.memory_space<vmem>>, vector<1x128xf32>
    %5 = vector.broadcast %4 : vector<1x128xf32> to vector<8x128xf32>
    %6 = arith.addf %3, %5 : vector<8x128xf32>
    %cst_5 = arith.constant 0.000000e+00 : f32
    %7 = vector.broadcast %cst_5 : f32 to vector<8x128xf32>
    %8 = arith.maximumf %6, %7 : vector<8x128xf32>
    %9 = arith.truncf %8 : vector<8x128xf32> to vector<8x128xbf16>
    %c32 = arith.constant 32 : index
    %c0_6 = arith.constant 0 : index
    %10 = vector.load %arg2[%c32, %c0_6] : memref<544x128xbf16, #tpu.memory_space<vmem>>, vector<128x128xbf16>
    %cst_7 = arith.constant dense<0.000000e+00> : vector<8x128xf32>
    %11 = tpu.matmul %9, %10, %cst_7 {dimension_numbers = #tpu.dot_dimension_numbers<[1], [0], [0], [1], [0, 0, 1, 1], [], []>} : vector<8x128xbf16>, vector<128x128xbf16>, vector<8x128xf32> -> vector<8x128xf32>
    %c1 = arith.constant 1 : index
    %c0_8 = arith.constant 0 : index
    %12 = vector.load %arg3[%c1, %c0_8] : memref<8x128xf32, #tpu.memory_space<vmem>>, vector<1x128xf32>
    %13 = vector.broadcast %12 : vector<1x128xf32> to vector<8x128xf32>
    %14 = arith.addf %11, %13 : vector<8x128xf32>
    %cst_9 = arith.constant 0.000000e+00 : f32
    %15 = vector.broadcast %cst_9 : f32 to vector<8x128xf32>
    %16 = arith.maximumf %14, %15 : vector<8x128xf32>
    %17 = arith.truncf %16 : vector<8x128xf32> to vector<8x128xbf16>
    %c160 = arith.constant 160 : index
    %c0_10 = arith.constant 0 : index
    %18 = vector.load %arg2[%c160, %c0_10] : memref<544x128xbf16, #tpu.memory_space<vmem>>, vector<128x128xbf16>
    %cst_11 = arith.constant dense<0.000000e+00> : vector<8x128xf32>
    %19 = tpu.matmul %17, %18, %cst_11 {dimension_numbers = #tpu.dot_dimension_numbers<[1], [0], [0], [1], [0, 0, 1, 1], [], []>} : vector<8x128xbf16>, vector<128x128xbf16>, vector<8x128xf32> -> vector<8x128xf32>
    %c2 = arith.constant 2 : index
    %c0_12 = arith.constant 0 : index
    %20 = vector.load %arg3[%c2, %c0_12] : memref<8x128xf32, #tpu.memory_space<vmem>>, vector<1x128xf32>
    %21 = vector.broadcast %20 : vector<1x128xf32> to vector<8x128xf32>
    %22 = arith.addf %19, %21 : vector<8x128xf32>
    %cst_13 = arith.constant 0.000000e+00 : f32
    %23 = vector.broadcast %cst_13 : f32 to vector<8x128xf32>
    %24 = arith.maximumf %22, %23 : vector<8x128xf32>
    %25 = arith.truncf %24 : vector<8x128xf32> to vector<8x128xbf16>
    %c288 = arith.constant 288 : index
    %c0_14 = arith.constant 0 : index
    %26 = vector.load %arg2[%c288, %c0_14] : memref<544x128xbf16, #tpu.memory_space<vmem>>, vector<128x128xbf16>
    %cst_15 = arith.constant dense<0.000000e+00> : vector<8x128xf32>
    %27 = tpu.matmul %25, %26, %cst_15 {dimension_numbers = #tpu.dot_dimension_numbers<[1], [0], [0], [1], [0, 0, 1, 1], [], []>} : vector<8x128xbf16>, vector<128x128xbf16>, vector<8x128xf32> -> vector<8x128xf32>
    %c3 = arith.constant 3 : index
    %c0_16 = arith.constant 0 : index
    %28 = vector.load %arg3[%c3, %c0_16] : memref<8x128xf32, #tpu.memory_space<vmem>>, vector<1x128xf32>
    %29 = vector.broadcast %28 : vector<1x128xf32> to vector<8x128xf32>
    %30 = arith.addf %27, %29 : vector<8x128xf32>
    %cst_17 = arith.constant 3.000000e+00 : f32
    %31 = vector.broadcast %cst_17 : f32 to vector<8x128xf32>
    %32 = arith.addf %30, %31 : vector<8x128xf32>
    %cst_18 = arith.constant 0.000000e+00 : f32
    %cst_19 = arith.constant 6.000000e+00 : f32
    %33 = vector.broadcast %cst_18 : f32 to vector<8x128xf32>
    %34 = arith.maximumf %33, %32 : vector<8x128xf32>
    %35 = vector.broadcast %cst_19 : f32 to vector<8x128xf32>
    %36 = arith.minimumf %35, %34 : vector<8x128xf32>
    %37 = arith.mulf %30, %36 : vector<8x128xf32>
    %cst_20 = arith.constant 0.166666672 : f32
    %38 = vector.broadcast %cst_20 : f32 to vector<8x128xf32>
    %39 = arith.mulf %37, %38 : vector<8x128xf32>
    %40 = arith.truncf %39 : vector<8x128xf32> to vector<8x128xbf16>
    %c416 = arith.constant 416 : index
    %c0_21 = arith.constant 0 : index
    %41 = vector.load %arg2[%c416, %c0_21] : memref<544x128xbf16, #tpu.memory_space<vmem>>, vector<128x128xbf16>
    %cst_22 = arith.constant dense<0.000000e+00> : vector<8x128xf32>
    %42 = tpu.matmul %40, %41, %cst_22 {dimension_numbers = #tpu.dot_dimension_numbers<[1], [0], [0], [1], [0, 0, 1, 1], [], []>} : vector<8x128xbf16>, vector<128x128xbf16>, vector<8x128xf32> -> vector<8x128xf32>
    %c4 = arith.constant 4 : index
    %c0_23 = arith.constant 0 : index
    %43 = vector.load %arg3[%c4, %c0_23] : memref<8x128xf32, #tpu.memory_space<vmem>>, vector<1x128xf32>
    %44 = vector.broadcast %43 : vector<1x128xf32> to vector<8x128xf32>
    %45 = arith.addf %42, %44 : vector<8x128xf32>
    %46 = tpu.iota {dimensions = array<i32: 1>} : vector<8x128xi32>
    %c8_i32 = arith.constant 8 : i32
    %47 = vector.broadcast %c8_i32 : i32 to vector<8x128xi32>
    %48 = arith.cmpi sge, %46, %47 : vector<8x128xi32>
    %c16_i32 = arith.constant 16 : i32
    %49 = vector.broadcast %c16_i32 : i32 to vector<8x128xi32>
    %50 = arith.cmpi slt, %46, %49 : vector<8x128xi32>
    %51 = arith.andi %48, %50 : vector<8x128xi1>
    %cst_24 = arith.constant -2.000000e+01 : f32
    %cst_25 = arith.constant 2.000000e+00 : f32
    %52 = vector.broadcast %cst_24 : f32 to vector<8x128xf32>
    %53 = arith.maximumf %52, %45 : vector<8x128xf32>
    %54 = vector.broadcast %cst_25 : f32 to vector<8x128xf32>
    %55 = arith.minimumf %54, %53 : vector<8x128xf32>
    %56 = arith.select %51, %55, %45 : vector<8x128xi1>, vector<8x128xf32>
    %57 = arith.truncf %56 : vector<8x128xf32> to vector<8x128xbf16>
    %c0_26 = arith.constant 0 : index
    %c0_27 = arith.constant 0 : index
    %58 = vector.load %arg4[%c0_26, %c0_27] : memref<8x128xbf16, #tpu.memory_space<vmem>>, vector<8x128xbf16>
    tpu.vector_store %arg4[%c0_26, %c0_27], %57 {strides = array<i32>} : memref<8x128xbf16, #tpu.memory_space<vmem>>, vector<8x128xbf16>,
    return
  }
  func.func @transform_0(%arg0: i32) -> (i32, i32) {
    %c0_i32 = arith.constant 0 : i32
    %c0_i32_0 = arith.constant 0 : i32
    return %arg0, %c0_i32 : i32, i32
  }
  func.func @transform_1(%arg0: i32) -> (i32, i32) {
    %c0_i32 = arith.constant 0 : i32
    %c0_i32_0 = arith.constant 0 : i32
    %c0_i32_1 = arith.constant 0 : i32
    return %c0_i32, %c0_i32_0 : i32, i32
  }
  func.func @transform_2(%arg0: i32) -> (i32, i32) {
    %c0_i32 = arith.constant 0 : i32
    %c0_i32_0 = arith.constant 0 : i32
    %c0_i32_1 = arith.constant 0 : i32
    return %c0_i32, %c0_i32_0 : i32, i32
  }
  func.func @transform_3(%arg0: i32) -> (i32, i32) {
    %c0_i32 = arith.constant 0 : i32
    %c0_i32_0 = arith.constant 0 : i32
    return %arg0, %c0_i32 : i32, i32
  }
}

</mosaic_0001>

<bundles_post_ra>
// kernel: policy_net_forward.1
= control target key start
LH: loop header
LB: loop body
LE: loop exit
PB: predicated region body
PF: predicated region fallthrough
CT: control target
= control target key end

     0   :  { %8 = vsyncpa [#allocation3], 0  ;;  %s971_s0 = inlined_call_operand.hbm [shape: f32[8,32], index: 0, kind: input, shape index: {}]   ;;  %s972_s1 = inlined_call_operand.hbm [shape: bf16[544,128], index: 1, kind: input, shape index: {}]   ;;  %s973_s2 = inlined_call_operand.hbm [shape: f32[8,128], index: 2, kind: input, shape index: {}]   ;;  %s974_s3 = inlined_call_operand.vmem [shape: bf16[8,128], index: 3, kind: output, shape index: {}]  }
   0x1   :  { %9 = vsyncpa [#allocation5], 0  ;;  %s861_s12 = smov [#allocation4]   ;;  %s791_s16 = scalar_lea.hbm %s972_s1, 4352 }
   0x2   :  { %s25_s13 = sshll.u32 %s861_s12, 4  ;;  %p792_p0 = scmp.ne.s32.totalorder %s972_s1, %s791_s16  ;;  %s26_s13 = int_to_ptr.vmem [resolvable:$true] %s25_s13 }
   0x3   :  { %p795_p1 = scmp.lt.u32.totalorder %s791_s16, %s972_s1 }
   0x5   :  { %p797_p2 = pnand %p795_p1, %p792_p0 }
   0x7   :  { %800 = shalt.err (!%p797_p2)
}
   0x8   :  { %s801_s21 = scalar_lea.vmem %s26_s13, 4352  ;;  %p806_p4 = scmp.lt.s32.totalorder %s26_s13, %s26_s13 }
   0x9   :  { %p802_p3 = scmp.ne.s32.totalorder %s26_s13, %s801_s21  ;;  %p807_p5 = scmp.lt.s32.totalorder %s801_s21, %s801_s21 }
   0xb   :  { %p808_p6 = por %p807_p5, %p806_p4 }
   0xd   :  { %p809_p7 = pnand %p808_p6, %p802_p3 }
   0xf   :  { %812 = shalt.err (!%p809_p7)
}
  0x10   :  { %s862_s22 = smov 64   ;;  %s863_s23 = smov 4  }
  0x11   :  { %31 = dma.hbm_to_vmem [thread:$0]  %s972_s1, 4352, %s26_s13, [#allocation5], %s862_s22, %s862_s22, %s863_s23  }
  0x12   :  { %s864_s26 = smov [#allocation2]   ;;  %s865_s28 = smov [#allocation6]  }
  0x13   :  { %s16_s27 = sshll.u32 %s864_s26, 4  ;;  %s38_s29 = sshll.u32 %s865_s28, 4  ;;  %s17_s27 = int_to_ptr.vmem [resolvable:$true] %s16_s27  ;;  %s39_s29 = int_to_ptr.vmem [resolvable:$true] %s38_s29 }
  0x14   :  { %s813_s5 = scalar_lea.hbm %s971_s0, 128 }
  0x15   :  { %p814_p8 = scmp.ne.s32.totalorder %s971_s0, %s813_s5  ;;  %p817_p9 = scmp.lt.u32.totalorder %s813_s5, %s971_s0 }
  0x17   :  { %p819_p10 = pnand %p817_p9, %p814_p8 }
  0x19   :  { %822 = shalt.err (!%p819_p10)
}
  0x1a   :  { %s823_s1 = scalar_lea.vmem %s17_s27, 128  ;;  %p828_p12 = scmp.lt.s32.totalorder %s17_s27, %s17_s27 }
  0x1b   :  { %p824_p11 = scmp.ne.s32.totalorder %s17_s27, %s823_s1  ;;  %p829_p13 = scmp.lt.s32.totalorder %s823_s1, %s823_s1 }
  0x1d   :  { %p830_p0 = por %p829_p13, %p828_p12 }
  0x1f   :  { %p831_p1 = pnand %p830_p0, %p824_p11 }
  0x21   :  { %834 = shalt.err (!%p831_p1)
}
  0x22   :  { %19 = dma.hbm_to_vmem [thread:$0]  %s971_s0, 128, %s17_s27, [#allocation3]  }
  0x23   :  { %s835_s14 = scalar_lea.hbm %s973_s2, 128 }
  0x24   :  { %p836_p2 = scmp.ne.s32.totalorder %s973_s2, %s835_s14  ;;  %p839_p3 = scmp.lt.u32.totalorder %s835_s14, %s973_s2 }
  0x26   :  { %p841_p4 = pnand %p839_p3, %p836_p2 }
  0x28   :  { %844 = shalt.err (!%p841_p4)
}
  0x29   :  { %s845_s19 = scalar_lea.vmem %s39_s29, 128  ;;  %p850_p6 = scmp.lt.s32.totalorder %s39_s29, %s39_s29 }
  0x2a   :  { %p846_p5 = scmp.ne.s32.totalorder %s39_s29, %s845_s19  ;;  %p851_p7 = scmp.lt.s32.totalorder %s845_s19, %s845_s19 }
  0x2c   :  { %p852_p8 = por %p851_p7, %p850_p6 }
  0x2e   :  { %p853_p9 = pnand %p852_p8, %p846_p5 }
  0x30   :  { %856 = shalt.err (!%p853_p9)
}
  0x31   :  { %41 = dma.hbm_to_vmem [thread:$0]  %s973_s2, 128, %s39_s29, [#allocation5]  }
  0x32   :  { %857 = dma.done.wait [#allocation3], 128  }
  0x33   :  { %858 = vsyncadd [#allocation3], 4294967168 }
  0x34   :  { %859 = dma.done.wait [#allocation5], 4480  }
  0x35   :  { %860 = vsyncadd [#allocation5], 4294962816  ;;  %v866_v0 = vmov 0.0   ;;  %vm867_vm0 = vmmov 0   ;;  %v757_v1 = vld [vmem:[#allocation4] sm:$0xff]   ;;  %v758_v2 = vld [vmem:[#allocation4 + $0x8] sm:$0xff]  }
  0x36   :  { %662 = vmatprep.subr.bf16.mxu0 %v866_v0  ;;  %666 = vmatprep.mubr.msk.bf16.mxu0 %vm867_vm0, %v866_v0  ;;  %v52_v3 = vld [vmem:[#allocation2] sm:$0xff]  ;;  %v759_v4 = vld [vmem:[#allocation4 + $0x10] sm:$0xff]   ;;  %vm75_vm1 = vcmask 261120   ;;  %v761_v7 = vld [vmem:[#allocation4 + $0x20] sm:$0xff]  }
  0x37   :  { %670 = vmatprep.subr.bf16.mxu1 %v866_v0  ;;  %686 = vmatprep.mubr.msk.bf16.mxu1 %vm867_vm0, %v866_v0  ;;  %v53_v5 = vpack.c.bf16 %v52_v3, %v52_v3  ;;  %v760_v6 = vld [vmem:[#allocation4 + $0x18] sm:$0xff]   ;;  %v762_v8 = vld [vmem:[#allocation4 + $0x28] sm:$0xff]   ;;  %v763_v9 = vld [vmem:[#allocation4 + $0x30] sm:$0xff]  }
  0x38   :  { %663 = vmatpush3.bf16.msra.mxu0 %v757_v1  ;;  %671 = vmatpush3.bf16.msra.mxu1 %v759_v4  ;;  %v764_v10 = vld [vmem:[#allocation4 + $0x38] sm:$0xff]   ;;  %v765_v11 = vld [vmem:[#allocation4 + $0x40] sm:$0xff]   ;;  %v766_v12 = vld [vmem:[#allocation4 + $0x48] sm:$0xff]  }
  0x39   :  { %664 = vmatprep.subr.bf16.mxu0 %v866_v0  ;;  %672 = vmatprep.subr.bf16.mxu1 %v866_v0  ;;  %v767_v13 = vld [vmem:[#allocation4 + $0x50] sm:$0xff]   ;;  %v768_v14 = vld [vmem:[#allocation4 + $0x58] sm:$0xff]   ;;  %v769_v15 = vld [vmem:[#allocation4 + $0x60] sm:$0xff]  }
  0x3a   :  { %v770_v16 = vld [vmem:[#allocation4 + $0x68] sm:$0xff]   ;;  %v771_v17 = vld [vmem:[#allocation4 + $0x70] sm:$0xff]   ;;  %v772_v18 = vld [vmem:[#allocation4 + $0x78] sm:$0xff]  }
  0x3b   :  { %v583_v19 = vld [vmem:[#allocation6] ss:$0 sm:$0xff]  ;;  %v773_v27 = vld [vmem:[#allocation4 + $0x80] sm:$0xff]   ;;  %v774_v28 = vld [vmem:[#allocation4 + $0x88] sm:$0xff]  }
  0x3c   :  { %665 = vmatpush3.bf16.msra.mxu0 %v758_v2  ;;  %673 = vmatpush3.bf16.msra.mxu1 %v760_v6  ;;  %v775_v29 = vld [vmem:[#allocation4 + $0x90] sm:$0xff]   ;;  %v776_v30 = vld [vmem:[#allocation4 + $0x98] sm:$0xff]   ;;  %v777_v31 = vld [vmem:[#allocation4 + $0xa0] sm:$0xff]  }
  0x3d   :  { %690 = vmatprep.subr.bf16.mxu0 %v866_v0  ;;  %674 = vmatprep.subr.bf16.mxu1 %v866_v0  ;;  %v778_v32 = vld [vmem:[#allocation4 + $0xa8] sm:$0xff]   ;;  %v779_v33 = vld [vmem:[#allocation4 + $0xb0] sm:$0xff]   ;;  %v780_v34 = vld [vmem:[#allocation4 + $0xb8] sm:$0xff]  }
  0x3e   :  { %v587_v35 = vld [vmem:[#allocation6 + $0x1] ss:$0 sm:$0xff]  ;;  %v781_v43 = vld [vmem:[#allocation4 + $0xc0] sm:$0xff]   ;;  %v782_v44 = vld [vmem:[#allocation4 + $0xc8] sm:$0xff]  }
  0x3f   :  { %667 = vmatmul.mubr.msk.bf16.vlgmr.msra.gmra.mrb[0].mxu0 %vm75_vm1, %v53_v5  ;;  %v783_v45 = vld [vmem:[#allocation4 + $0xd0] sm:$0xff]   ;;  %v784_v46 = vld [vmem:[#allocation4 + $0xd8] sm:$0xff]   ;;  %v785_v47 = vld [vmem:[#allocation4 + $0xe0] sm:$0xff]  }
  0x40   :  { %706 = vmatprep.mubr.msk.bf16.mxu0 %vm867_vm0, %v866_v0  ;;  %675 = vmatpush3.bf16.msra.mxu1 %v761_v7  ;;  %v786_v48 = vld [vmem:[#allocation4 + $0xe8] sm:$0xff]   ;;  %v596_v49 = vld [vmem:[#allocation6 + $0x2] ss:$0 sm:$0xff]  ;;  %v788_v58 = vld [vmem:[#allocation4 + $0xf8] sm:$0xff]  }
  0x41   :  { %676 = vmatprep.subr.bf16.mxu1 %v866_v0  ;;  %691 = vmatpush3.bf16.msra.mxu0 %v767_v13  ;;  %v787_v57 = vld [vmem:[#allocation4 + $0xf0] sm:$0xff]   ;;  %v789_v59 = vld [vmem:[#allocation4 + $0x100] sm:$0xff]   ;;  %v790_v60 = vld [vmem:[#allocation4 + $0x108] sm:$0xff]  }
  0x42   :  { %692 = vmatprep.subr.bf16.mxu0 %v866_v0  ;;  %v605_v61 = vld [vmem:[#allocation6 + $0x3] ss:$0 sm:$0xff] }
  0x44   :  { %677 = vmatpush3.bf16.msra.mxu1 %v762_v8 }
  0x45   :  { %678 = vmatprep.subr.bf16.mxu1 %v866_v0  ;;  %693 = vmatpush3.bf16.msra.mxu0 %v768_v14 }
  0x46   :  { %694 = vmatprep.subr.bf16.mxu0 %v866_v0 }
  0x48   :  { %679 = vmatpush3.bf16.msra.mxu1 %v763_v9 }
  0x49   :  { %680 = vmatprep.subr.bf16.mxu1 %v866_v0  ;;  %695 = vmatpush3.bf16.msra.mxu0 %v769_v15 }
  0x4a   :  { %696 = vmatprep.subr.bf16.mxu0 %v866_v0 }
  0x4c   :  { %681 = vmatpush3.bf16.msra.mxu1 %v764_v10  ;;  %v567_v10 = vlaneseq }
  0x4d   :  { %682 = vmatprep.subr.bf16.mxu1 %v866_v0  ;;  %697 = vmatpush3.bf16.msra.mxu0 %v770_v16 }
  0x4e   :  { %698 = vmatprep.subr.bf16.mxu0 %v866_v0 }
  0x50   :  { %683 = vmatpush3.bf16.msra.mxu1 %v765_v11  ;;  %v568_v11 = vand.u32 127, %v567_v10 }
  0x51   :  { %684 = vmatprep.subr.bf16.mxu1 %v866_v0  ;;  %699 = vmatpush3.bf16.msra.mxu0 %v771_v17 }
  0x52   :  { %700 = vmatprep.subr.bf16.mxu0 %v866_v0  ;;  %vm569_vm2 = vcmp.ge.s32.totalorder %v568_v11, 8  ;;  %vm570_vm3 = vcmp.lt.s32.totalorder %v568_v11, 16 }
  0x53   :  { %vm571_vm4 = vmand %vm569_vm2, %vm570_vm3 }
  0x54   :  { %685 = vmatpush3.bf16.msra.mxu1 %v766_v12  ;;  %v614_v12 = vld [vmem:[#allocation6 + $0x4] ss:$0 sm:$0xff] }
  0x55   :  { %710 = vmatprep.subr.bf16.mxu1 %v866_v0  ;;  %701 = vmatpush3.bf16.msra.mxu0 %v772_v18 }
  0x56   :  { %702 = vmatprep.subr.bf16.mxu0 %v866_v0 }
  0x59   :  { %703 = vmatpush3.bf16.msra.mxu0 %v773_v27 }
  0x5a   :  { %704 = vmatprep.subr.bf16.mxu0 %v866_v0 }
  0x5d   :  { %705 = vmatpush3.bf16.msra.mxu0 %v774_v28 }
  0x5e   :  { %730 = vmatprep.subr.bf16.mxu0 %v866_v0 }
 0x112   :  { %v113_v20 = vpop.f32.mrb[0].mxu0 }
 0x113   :  { %v114_v21 = vadd.f32 %v583_v19, %v113_v20  ;;  %v668_v22 = vpop.f32.mrb[1].mxu0 }
 0x114   :  { %v116_v23 = vpop.f32.mrb[2].mxu0 }
 0x115   :  { %v119_v24 = vmax.f32 %v114_v21, 0.0  ;;  %v669_v25 = vpop.f32.mrb[3].mxu0 }
 0x117   :  { %v120_v26 = vpack.c.bf16 %v119_v24, %v119_v24 }
 0x119   :  { %687 = vmatmul.mubr.bf16.vlgmr.msra.gmra.mrb[0].mxu1 %v120_v26 }
 0x11a   :  { %726 = vmatprep.mubr.msk.bf16.mxu1 %vm867_vm0, %v866_v0  ;;  %711 = vmatpush3.bf16.msra.mxu1 %v775_v29 }
 0x11b   :  { %712 = vmatprep.subr.bf16.mxu1 %v866_v0 }
 0x11e   :  { %713 = vmatpush3.bf16.msra.mxu1 %v776_v30 }
 0x11f   :  { %714 = vmatprep.subr.bf16.mxu1 %v866_v0 }
 0x122   :  { %715 = vmatpush3.bf16.msra.mxu1 %v777_v31 }
 0x123   :  { %716 = vmatprep.subr.bf16.mxu1 %v866_v0 }
 0x126   :  { %717 = vmatpush3.bf16.msra.mxu1 %v778_v32 }
 0x127   :  { %718 = vmatprep.subr.bf16.mxu1 %v866_v0 }
 0x12a   :  { %719 = vmatpush3.bf16.msra.mxu1 %v779_v33 }
 0x12b   :  { %720 = vmatprep.subr.bf16.mxu1 %v866_v0 }
 0x12e   :  { %721 = vmatpush3.bf16.msra.mxu1 %v780_v34 }
 0x12f   :  { %722 = vmatprep.subr.bf16.mxu1 %v866_v0 }
 0x132   :  { %723 = vmatpush3.bf16.msra.mxu1 %v781_v43 }
 0x133   :  { %724 = vmatprep.subr.bf16.mxu1 %v866_v0 }
 0x136   :  { %725 = vmatpush3.bf16.msra.mxu1 %v782_v44 }
 0x1ec   :  { %v224_v36 = vpop.f32.mrb[0].mxu1 }
 0x1ed   :  { %v225_v37 = vadd.f32 %v587_v35, %v224_v36  ;;  %v688_v38 = vpop.f32.mrb[1].mxu1 }
 0x1ee   :  { %v227_v39 = vpop.f32.mrb[2].mxu1 }
 0x1ef   :  { %v230_v40 = vmax.f32 %v225_v37, 0.0  ;;  %v689_v41 = vpop.f32.mrb[3].mxu1 }
 0x1f1   :  { %v231_v42 = vpack.c.bf16 %v230_v40, %v230_v40 }
 0x1f3   :  { %707 = vmatmul.mubr.bf16.vlgmr.msra.gmra.mrb[4].mxu0 %v231_v42 }
 0x1f4   :  { %746 = vmatprep.mubr.msk.bf16.mxu0 %vm867_vm0, %v866_v0  ;;  %731 = vmatpush3.bf16.msra.mxu0 %v783_v45 }
 0x1f5   :  { %732 = vmatprep.subr.bf16.mxu0 %v866_v0 }
 0x1f8   :  { %733 = vmatpush3.bf16.msra.mxu0 %v784_v46 }
 0x1f9   :  { %734 = vmatprep.subr.bf16.mxu0 %v866_v0 }
 0x1fc   :  { %735 = vmatpush3.bf16.msra.mxu0 %v785_v47 }
 0x1fd   :  { %736 = vmatprep.subr.bf16.mxu0 %v866_v0 }
 0x200   :  { %737 = vmatpush3.bf16.msra.mxu0 %v786_v48 }
 0x201   :  { %738 = vmatprep.subr.bf16.mxu0 %v866_v0 }
 0x204   :  { %739 = vmatpush3.bf16.msra.mxu0 %v787_v57 }
 0x205   :  { %740 = vmatprep.subr.bf16.mxu0 %v866_v0 }
 0x208   :  { %741 = vmatpush3.bf16.msra.mxu0 %v788_v58 }
 0x209   :  { %742 = vmatprep.subr.bf16.mxu0 %v866_v0 }
 0x20c   :  { %743 = vmatpush3.bf16.msra.mxu0 %v789_v59 }
 0x20d   :  { %744 = vmatprep.subr.bf16.mxu0 %v866_v0 }
 0x210   :  { %745 = vmatpush3.bf16.msra.mxu0 %v790_v60 }
 0x2c6   :  { %v335_v50 = vpop.f32.mrb[4].mxu0 }
 0x2c7   :  { %v336_v51 = vadd.f32 %v596_v49, %v335_v50  ;;  %v708_v52 = vpop.f32.mrb[5].mxu0 }
 0x2c8   :  { %v338_v53 = vpop.f32.mrb[6].mxu0 }
 0x2c9   :  { %v341_v54 = vmax.f32 %v336_v51, 0.0  ;;  %v709_v55 = vpop.f32.mrb[7].mxu0 }
 0x2cb   :  { %v342_v56 = vpack.c.bf16 %v341_v54, %v341_v54 }
 0x2cd   :  { %727 = vmatmul.mubr.bf16.vlgmr.msra.gmra.mrb[4].mxu1 %v342_v56 }
 0x3a0   :  { %v446_v62 = vpop.f32.mrb[4].mxu1 }
 0x3a1   :  { %v447_v63 = vadd.f32 %v605_v61, %v446_v62  ;;  %v728_v1 = vpop.f32.mrb[5].mxu1 }
 0x3a2   :  { %v449_v2 = vpop.f32.mrb[6].mxu1 }
 0x3a3   :  { %v452_v3 = vadd.f32 3.0, %v447_v63  ;;  %v729_v4 = vpop.f32.mrb[7].mxu1 }
 0x3a5   :  { %v453_v5 = vmax.f32 %v452_v3, 0.0 }
 0x3a7   :  { %v454_v6 = vmin.f32 %v453_v5, 6.0 }
 0x3a9   :  { %v455_v7 = vmul.f32 %v454_v6, %v447_v63 }
 0x3ab   :  { %v456_v8 = vmul.f32 0.16666667, %v455_v7 }
 0x3ad   :  { %v457_v9 = vpack.c.bf16 %v456_v8, %v456_v8 }
 0x3af   :  { %747 = vmatmul.mubr.bf16.vlgmr.msra.gmra.mrb[8].mxu0 %v457_v9 }
 0x482   :  { %v561_v13 = vpop.f32.mrb[8].mxu0 }
 0x483   :  { %v562_v0 = vadd.f32 %v614_v12, %v561_v13  ;;  %v748_v14 = vpop.f32.mrb[9].mxu0 }
 0x484   :  { %v564_v15 = vpop.f32.mrb[10].mxu0 }
 0x485   :  { %v572_v16 = vmax.f32 %v562_v0, -20.0  ;;  %v749_v17 = vpop.f32.mrb[11].mxu0 }
 0x487   :  { %v573_v18 = vmin.f32 %v572_v16, 2.0 }
 0x489   :  { %v574_v19 = vsel %vm571_vm4, %v573_v18, %v562_v0 }
 0x48a   :  { %v575_v20 = vpack.c.bf16 %v574_v19, %v574_v19 }
 0x48c   :  { %576 = vst [vmem:[%s974_s3] sm:$0xf] %v575_v20 }
 0x48d   :  { %581 = vsyncpa [#allocation3], 1 }
 0x48e   :  { %582 = vsyncpa [#allocation5], 1 }

</bundles_post_ra>
